<compile_context>
chip_gen: v6e
topology: v6e:2x2x1
jax: 0.10.0
libtpu: 0.0.40
codegen_flags: <defaults>
</compile_context>

<pallas_src>
import functools

import jax
import jax.numpy as jnp
from jax.experimental import pallas as pl
from jax.experimental.pallas import tpu as pltpu


_LANES = 128                      # MXU / vreg lane width
_VMEM_BUDGET = 24 * 1024 * 1024   # per-step working-set target (v7x-safe)


def _round_up(x, m):
    return -(-x // m) * m


# ---------------------------------------------------------------------------
# Pallas kernel: one fused gated-conv H-tile.
#   x_ref : (TH + hq_extra, sh, wq, sw*cin)  stride-folded, zero-padded input
#   w_ref : (Kp, 2*Cp)  conv-weights ‖ gate-weights, split at Cp (128-multiple)
#   b_ref : (1, 2*Cp)   f32 biases
#   o_ref : (TH*wout_c, Cp)  lane-dense gated output tile
# ---------------------------------------------------------------------------
def _gate_conv_kernel(x_ref, w_ref, b_ref, o_ref, *,
                      kh, sh, sw, cin, cp, th, wout_c, wq_groups):
    # im2col: one full-lane (sw*cin wide) slab per (ki, qw) tap group;
    # every slab is a contiguous slice of the stride-folded layout.
    slabs = []
    for ki in range(kh):
        qh, rh = divmod(ki, sh)
        for g in range(wq_groups):
            t = x_ref[pl.ds(qh, th), pl.ds(rh, 1), pl.ds(g, wout_c), :]
            slabs.append(t.reshape(th, wout_c, sw * cin))
    patches = jnp.concatenate(slabs, axis=-1) if len(slabs) > 1 else slabs[0]
    patches = patches.reshape(th * wout_c, kh * wq_groups * sw * cin)

    # One MXU matmul produces BOTH branches (N = 2*Cp, 128-aligned halves),
    # accumulating in f32.
    acc = jnp.dot(patches, w_ref[...], preferred_element_type=jnp.float32)
    acc = acc + b_ref[...]                                    # f32 bias add

    # f32 gate on VPU/EUP; lane-dense store (no crop / reshape in-kernel).
    o_ref[...] = (acc[:, :cp] * jax.nn.sigmoid(acc[:, cp:])).astype(o_ref.dtype)


# ---------------------------------------------------------------------------
# H-tile size from a VMEM working-set budget.
# ---------------------------------------------------------------------------
def _pick_tile_h(hout, *, sh, sw, cin, wq, wout_c, kp, cp, cbytes, hq_extra):
    in_row = 2 * sh * wq * sw * cin * cbytes        # input block rows (x2 bufs)
    out_row = 2 * wout_c * cp * 4                   # output block rows (x2 bufs)
    acc_row = wout_c * 2 * cp * 4                   # f32 matmul accumulator
    patch_row = wout_c * kp * cbytes                # im2col slab
    fixed = (2 * hq_extra * sh * wq * sw * cin * cbytes   # halo rows
             + 2 * kp * 2 * cp * cbytes                    # resident weights
             + 4 * 2 * cp * 4)                             # bias + slack
    per_row = in_row + out_row + acc_row + patch_row
    th = max(1, (_VMEM_BUDGET - fixed) // per_row)
    return int(min(th, hout))


# ---------------------------------------------------------------------------
# Wrapper: layout plumbing (cast / pads / fold / halo duplication) + pallas_call.
# ---------------------------------------------------------------------------
def _gated_conv2d(x, w_conv, b_conv, w_gate, b_gate, *,
                  kernel_size, stride, pad, hout, wout, compute_dtype, tile_h):
    """x: (B, Cin, H, W); w_*: (Cout, Cin, kh, kw); pad = (wl, wr, ht, hb).
    Returns (B, Cout, hout, wout) = conv(x) * sigmoid(gate_conv(x))."""
    kh, kw = kernel_size
    sh, sw = stride
    wl, wr, ht, hb = pad
    B, cin, _, _ = x.shape
    cout = w_conv.shape[0]
    cbytes = jnp.dtype(compute_dtype).itemsize

    cp = _round_up(cout, _LANES)          # lane-dense N, 128-aligned branch split
    wout_c = _round_up(wout, 8)           # sublane-aligned compute width
    wq_groups = -(-kw // sw)              # taps grouped per folded column
    kp = kh * wq_groups * sw * cin        # packed contraction length
    hq_extra = (kh - 1) // sh             # fold-row halo per H tile
    wq = wout_c + (kw - 1) // sw

    # --- H tiling -------------------------------------------------------------
    if tile_h is None:
        tile_h = _pick_tile_h(hout, sh=sh, sw=sw, cin=cin, wq=wq,
                              wout_c=wout_c, kp=kp, cp=cp, cbytes=cbytes,
                              hq_extra=hq_extra)
    th = max(1, min(int(tile_h), hout))
    n_ht = -(-hout // th)
    hout_p = n_ht * th
    hq_blk = th + hq_extra
    hq_total = hout_p + hq_extra
    hfold, wfold = sh * hq_total, sw * wq

    # --- layout plumbing: cast early (bf16 DMA), pad, stride-fold -------------
    xp = jnp.pad(x.transpose(0, 2, 3, 1).astype(compute_dtype),
                 ((0, 0), (ht, hb), (wl, wr), (0, 0)))
    xp = xp[:, :hfold, :wfold, :]
    xp = jnp.pad(xp, ((0, 0), (0, hfold - xp.shape[1]),
                      (0, wfold - xp.shape[2]), (0, 0)))
    xf = xp.reshape(B, hq_total, sh, wq, sw * cin)
    if n_ht == 1:
        xt = xf
    else:  # duplicate the hq_extra halo rows so H-tiles are non-overlapping
        xt = jnp.concatenate(
            [xf[:, t * th:t * th + hq_blk][:, None] for t in range(n_ht)],
            axis=1)
    xt = xt.reshape(B * n_ht * hq_blk, sh, wq, sw * cin)

    # --- weight / bias packing: K order (ki, qw, rw, ci); N = conv‖gate -------
    def _pack(w):  # (cout, cin, kh, kw) -> (Kp, Cp)
        w = jnp.pad(w, ((0, cp - cout), (0, 0), (0, 0),
                        (0, wq_groups * sw - kw)))
        return jnp.transpose(w, (2, 3, 1, 0)).reshape(kp, cp)

    w_packed = jnp.concatenate([_pack(w_conv), _pack(w_gate)],
                               axis=1).astype(compute_dtype)
    b_packed = jnp.concatenate(
        [jnp.pad(b_conv, (0, cp - cout)), jnp.pad(b_gate, (0, cp - cout))]
    )[None, :].astype(jnp.float32)

    kernel = functools.partial(
        _gate_conv_kernel, kh=kh, sh=sh, sw=sw, cin=cin, cp=cp, th=th,
        wout_c=wout_c, wq_groups=wq_groups)

    out = pl.pallas_call(
        kernel,
        out_shape=jax.ShapeDtypeStruct((B * n_ht * th * wout_c, cp),
                                       jnp.float32),
        grid=(B * n_ht,),
        in_specs=[
            pl.BlockSpec((hq_blk, sh, wq, sw * cin), lambda g: (g, 0, 0, 0)),
            pl.BlockSpec((kp, 2 * cp), lambda g: (0, 0)),
            pl.BlockSpec((1, 2 * cp), lambda g: (0, 0)),
        ],
        out_specs=pl.BlockSpec((th * wout_c, cp), lambda g: (g, 0)),
        compiler_params=pltpu.CompilerParams(
            dimension_semantics=("parallel",),
            vmem_limit_bytes=64 * 1024 * 1024),
    )(xt, w_packed, b_packed)

    # Crop the lane / sublane / H padding and do the NCHW transpose here
    # (wrapper side), so the kernel's store stays lane-dense.
    out = out.reshape(B, hout_p, wout_c, cp)[:, :hout, :wout, :cout]
    return out.transpose(0, 3, 1, 2)


def gate_conv_forward(x, params, *, kernel_size, stride, de_flag=0,
                      pad=(0, 0, 0, 0), chomp=1,
                      compute_dtype=jnp.bfloat16, tile_h=None):
    """Gate_Conv.forward.  x: (B, Cin, H, W), PyTorch NCHW layout."""
    kh, kw = kernel_size
    sh, sw = stride
    B, cin, H, W = x.shape

    if de_flag == 0:
        wl, wr, ht, hb = pad
        Hp, Wp = H + ht + hb, W + wl + wr
        hout = (Hp - kh) // sh + 1
        wout = (Wp - kw) // sw + 1
        return _gated_conv2d(x, params["conv_w"], params["conv_b"],
                             params["gate_w"], params["gate_b"],
                             kernel_size=(kh, kw), stride=(sh, sw),
                             pad=(wl, wr, ht, hb), hout=hout, wout=wout,
                             compute_dtype=compute_dtype, tile_h=tile_h)

    # de_flag == 1: ConvTranspose2d(stride) + Chomp_T(chomp), gated.
    # Zero-dilate the input by the stride, flip+transpose the kernels, run a
    # stride-1 conv with (k-1) padding; Chomp_T is realized by simply never
    # computing the chomped rows.
    # TODO(synk): replace the zero-dilated input with a polyphase (sub-pixel)
    # decomposition to drop the (sh*sw-1)/(sh*sw) zero-MAC and DMA waste.
    w_c = jnp.flip(params["conv_w"], axis=(2, 3)).transpose(1, 0, 2, 3)
    w_g = jnp.flip(params["gate_w"], axis=(2, 3)).transpose(1, 0, 2, 3)
    Hd, Wd = (H - 1) * sh + 1, (W - 1) * sw + 1
    xd = jnp.zeros((B, cin, Hd, Wd), x.dtype).at[:, :, ::sh, ::sw].set(x)
    hout = (H - 1) * sh + kh - chomp
    wout = (W - 1) * sw + kw
    return _gated_conv2d(xd, w_c, params["conv_b"], w_g, params["gate_b"],
                         kernel_size=(kh, kw), stride=(1, 1),
                         pad=(kw - 1, kw - 1, kh - 1, kh - 1),
                         hout=hout, wout=wout,
                         compute_dtype=compute_dtype, tile_h=tile_h)


# ---------------------------------------------------------------------------
# Deterministic parameter init (mirrors Gate_Conv.__init__ shapes).
# ---------------------------------------------------------------------------
def init_gate_conv_params(key, cin, cout, kernel_size, de_flag=0):
    kh, kw = kernel_size
    k = jax.random.split(key, 4)
    s = (cin * kh * kw) ** -0.5
    wshape = (cout, cin, kh, kw) if de_flag == 0 else (cin, cout, kh, kw)
    return {
        "conv_w": s * jax.random.normal(k[0], wshape, jnp.float32),
        "conv_b": s * jax.random.normal(k[1], (cout,), jnp.float32),
        "gate_w": s * jax.random.normal(k[2], wshape, jnp.float32),
        "gate_b": s * jax.random.normal(k[3], (cout,), jnp.float32),
    }


# ---------------------------------------------------------------------------
# Pure-JAX reference mirroring the PyTorch forward exactly.
# ---------------------------------------------------------------------------
def _ref_gate_conv(x, params, *, kernel_size, stride, de_flag=0,
                   pad=(0, 0, 0, 0), chomp=1):
    HI = jax.lax.Precision.HIGHEST
    kh, kw = kernel_size
    sh, sw = stride
    if de_flag == 0:
        wl, wr, ht, hb = pad
        xp = jnp.pad(x, ((0, 0), (0, 0), (ht, hb), (wl, wr)))

        def conv(w, b):
            y = jax.lax.conv_general_dilated(
                xp, w, window_strides=(sh, sw), padding="VALID",
                dimension_numbers=("NCHW", "OIHW", "NCHW"), precision=HI)
            return y + b[None, :, None, None]

        return (conv(params["conv_w"], params["conv_b"]) *
                jax.nn.sigmoid(conv(params["gate_w"], params["gate_b"])))

    def tconv(w, b):
        w_eq = jnp.flip(w, axis=(2, 3)).transpose(1, 0, 2, 3)
        y = jax.lax.conv_general_dilated(
            x, w_eq, window_strides=(1, 1),
            padding=((kh - 1, kh - 1), (kw - 1, kw - 1)),
            lhs_dilation=(sh, sw),
            dimension_numbers=("NCHW", "OIHW", "NCHW"), precision=HI)
        return y + b[None, :, None, None]

    out = (tconv(params["conv_w"], params["conv_b"]) *
           jax.nn.sigmoid(tconv(params["gate_w"], params["gate_b"])))
    return out[:, :, :-chomp, :]


# ---------------------------------------------------------------------------
if __name__ == "__main__":
    key = jax.random.PRNGKey(0)
    kx1, kp1, kx2, kp2 = jax.random.split(key, 4)

    # ---- case 1: de_flag=0 (ConstantPad2d + strided gated Conv2d) ------------
    B, cin, cout, H, W = 2, 4, 8, 16, 16
    ksz, strd, pad = (2, 3), (1, 2), (1, 1, 1, 0)   # pad = (Wl, Wr, Ht, Hb)
    x1 = jax.random.normal(kx1, (B, cin, H, W), jnp.float32)
    p1 = init_gate_conv_params(kp1, cin, cout, ksz, de_flag=0)
    ref1 = _ref_gate_conv(x1, p1, kernel_size=ksz, stride=strd,
                          de_flag=0, pad=pad)

    # f32 operands, auto H-tile (fits in one tile at this size)
    f32_fwd = jax.jit(functools.partial(
        gate_conv_forward, kernel_size=ksz, stride=strd, de_flag=0, pad=pad,
        compute_dtype=jnp.float32))
    out1 = jax.block_until_ready(f32_fwd(x1, p1))
    assert out1.shape == ref1.shape, (out1.shape, ref1.shape)
    err1 = float(jnp.max(jnp.abs(out1 - ref1)))
    assert err1 < 1e-4, f"de_flag=0 f32 max abs error {err1}"

    # forced small H tile: exercises multi-tile grid, halo duplication and
    # the padded hout_p > hout path.
    tiled_fwd = jax.jit(functools.partial(
        gate_conv_forward, kernel_size=ksz, stride=strd, de_flag=0, pad=pad,
        compute_dtype=jnp.float32, tile_h=6))
    out1t = jax.block_until_ready(tiled_fwd(x1, p1))
    errt = float(jnp.max(jnp.abs(out1t - ref1)))
    assert errt < 1e-4, f"de_flag=0 tiled max abs error {errt}"

    # default path: bf16 matmul operands / bf16 input DMA, f32 accumulate+gate
    bf_fwd = jax.jit(functools.partial(
        gate_conv_forward, kernel_size=ksz, stride=strd, de_flag=0, pad=pad))
    out1b = jax.block_until_ready(bf_fwd(x1, p1))
    errb = float(jnp.max(jnp.abs(out1b - ref1)))
    assert errb < 5e-2, f"de_flag=0 bf16 max abs error {errb}"

    # ---- case 2: de_flag=1 (gated ConvTranspose2d + Chomp_T) -----------------
    B2, cin2, cout2, H2, W2 = 2, 8, 4, 8, 8
    ksz2, strd2, chomp = (2, 3), (1, 2), 1
    x2 = jax.random.normal(kx2, (B2, cin2, H2, W2), jnp.float32)
    p2 = init_gate_conv_params(kp2, cin2, cout2, ksz2, de_flag=1)
    ref2 = _ref_gate_conv(x2, p2, kernel_size=ksz2, stride=strd2,
                          de_flag=1, chomp=chomp)

    t_fwd = jax.jit(functools.partial(
        gate_conv_forward, kernel_size=ksz2, stride=strd2, de_flag=1,
        chomp=chomp, compute_dtype=jnp.float32, tile_h=3))
    out2 = jax.block_until_ready(t_fwd(x2, p2))
    assert out2.shape == ref2.shape, (out2.shape, ref2.shape)
    err2 = float(jnp.max(jnp.abs(out2 - ref2)))
    assert err2 < 1e-4, f"de_flag=1 max abs error {err2}"

    print("KERNEL_OK")
</pallas_src>

<mosaic_0001>
module attributes {stable_mosaic.version = 11 : i64} {
  func.func @_gate_conv_kernel(%arg0: i32, %arg1: memref<17x1x9x8xf32, #tpu.memory_space<vmem>>, %arg2: memref<32x256xf32, #tpu.memory_space<vmem>>, %arg3: memref<1x256xf32, #tpu.memory_space<vmem>>, %arg4: memref<128x128xf32, #tpu.memory_space<vmem>>) attributes {dimension_semantics = [#tpu.dimension_semantics<parallel>], iteration_bounds = array<i64: 2>, scalar_prefetch = 0 : i64, scratch_operands = 0 : i64, tpu.core_type = #tpu.core_type<tc>, window_params = [{transform_indices = @transform_0, window_bounds = array<i64: 17, 1, 9, 8>}, {pipeline_mode = #tpu.pipeline_mode<synchronous>, transform_indices = @transform_1, window_bounds = array<i64: 32, 256>}, {pipeline_mode = #tpu.pipeline_mode<synchronous>, transform_indices = @transform_2, window_bounds = array<i64: 1, 256>}, {transform_indices = @transform_3, window_bounds = array<i64: 128, 128>}]} {
    %c0 = arith.constant 0 : index
    %c0_0 = arith.constant 0 : index
    %c0_1 = arith.constant 0 : index
    %c0_2 = arith.constant 0 : index
    %0 = vector.load %arg1[%c0, %c0_0, %c0_1, %c0_2] : memref<17x1x9x8xf32, #tpu.memory_space<vmem>>, vector<16x1x8x8xf32>
    %1 = vector.shape_cast %0 : vector<16x1x8x8xf32> to vector<16x8x8xf32>
    %c0_3 = arith.constant 0 : index
    %c0_4 = arith.constant 0 : index
    %c1 = arith.constant 1 : index
    %c0_5 = arith.constant 0 : index
    %2 = vector.load %arg1[%c0_3, %c0_4, %c1, %c0_5] : memref<17x1x9x8xf32, #tpu.memory_space<vmem>>, vector<16x1x8x8xf32>
    %3 = vector.shape_cast %2 : vector<16x1x8x8xf32> to vector<16x8x8xf32>
    %c1_6 = arith.constant 1 : index
    %c0_7 = arith.constant 0 : index
    %c0_8 = arith.constant 0 : index
    %c0_9 = arith.constant 0 : index
    %4 = vector.load %arg1[%c1_6, %c0_7, %c0_8, %c0_9] : memref<17x1x9x8xf32, #tpu.memory_space<vmem>>, vector<16x1x8x8xf32>
    %5 = vector.shape_cast %4 : vector<16x1x8x8xf32> to vector<16x8x8xf32>
    %c1_10 = arith.constant 1 : index
    %c0_11 = arith.constant 0 : index
    %c1_12 = arith.constant 1 : index
    %c0_13 = arith.constant 0 : index
    %6 = vector.load %arg1[%c1_10, %c0_11, %c1_12, %c0_13] : memref<17x1x9x8xf32, #tpu.memory_space<vmem>>, vector<16x1x8x8xf32>
    %7 = vector.shape_cast %6 : vector<16x1x8x8xf32> to vector<16x8x8xf32>
    %8 = tpu.concatenate %1, %3, %5, %7 in 2 : vector<16x8x8xf32>, vector<16x8x8xf32>, vector<16x8x8xf32>, vector<16x8x8xf32> -> vector<16x8x32xf32>
    %9 = vector.shape_cast %8 : vector<16x8x32xf32> to vector<128x32xf32>
    %c0_14 = arith.constant 0 : index
    %c0_15 = arith.constant 0 : index
    %10 = vector.load %arg2[%c0_14, %c0_15] : memref<32x256xf32, #tpu.memory_space<vmem>>, vector<32x256xf32>
    %cst = arith.constant dense<0.000000e+00> : vector<128x256xf32>
    %11 = tpu.matmul %9, %10, %cst {dimension_numbers = #tpu.dot_dimension_numbers<[1], [0], [0], [1], [0, 0, 1, 1], [], []>} : vector<128x32xf32>, vector<32x256xf32>, vector<128x256xf32> -> vector<128x256xf32>
    %c0_16 = arith.constant 0 : index
    %c0_17 = arith.constant 0 : index
    %12 = vector.load %arg3[%c0_16, %c0_17] : memref<1x256xf32, #tpu.memory_space<vmem>>, vector<1x256xf32>
    %13 = vector.broadcast %12 : vector<1x256xf32> to vector<128x256xf32>
    %14 = arith.addf %11, %13 : vector<128x256xf32>
    %15 = vector.extract_strided_slice %14 {offsets = [0, 0], sizes = [128, 128], strides = [1, 1]} : vector<128x256xf32> to vector<128x128xf32>
    %16 = vector.extract_strided_slice %14 {offsets = [0, 128], sizes = [128, 128], strides = [1, 1]} : vector<128x256xf32> to vector<128x128xf32>
    %17 = arith.negf %16 : vector<128x128xf32>
    %18 = math.exp %17 : vector<128x128xf32>
    %cst_18 = arith.constant 1.000000e+00 : f32
    %19 = vector.broadcast %cst_18 : f32 to vector<128x128xf32>
    %20 = arith.addf %19, %18 : vector<128x128xf32>
    %21 = arith.divf %19, %20 : vector<128x128xf32>
    %22 = arith.mulf %15, %21 : vector<128x128xf32>
    %c0_19 = arith.constant 0 : index
    %c0_20 = arith.constant 0 : index
    %23 = vector.load %arg4[%c0_19, %c0_20] : memref<128x128xf32, #tpu.memory_space<vmem>>, vector<128x128xf32>
    tpu.vector_store %arg4[%c0_19, %c0_20], %22 {strides = array<i32>} : memref<128x128xf32, #tpu.memory_space<vmem>>, vector<128x128xf32>,
    return
  }
  func.func @transform_0(%arg0: i32) -> (i32, i32, i32, i32) {
    %c0_i32 = arith.constant 0 : i32
    %c0_i32_0 = arith.constant 0 : i32
    %c0_i32_1 = arith.constant 0 : i32
    %c0_i32_2 = arith.constant 0 : i32
    return %arg0, %c0_i32, %c0_i32_0, %c0_i32_1 : i32, i32, i32, i32
  }
  func.func @transform_1(%arg0: i32) -> (i32, i32) {
    %c0_i32 = arith.constant 0 : i32
    %c0_i32_0 = arith.constant 0 : i32
    %c0_i32_1 = arith.constant 0 : i32
    return %c0_i32, %c0_i32_0 : i32, i32
  }
  func.func @transform_2(%arg0: i32) -> (i32, i32) {
    %c0_i32 = arith.constant 0 : i32
    %c0_i32_0 = arith.constant 0 : i32
    %c0_i32_1 = arith.constant 0 : i32
    return %c0_i32, %c0_i32_0 : i32, i32
  }
  func.func @transform_3(%arg0: i32) -> (i32, i32) {
    %c0_i32 = arith.constant 0 : i32
    %c0_i32_0 = arith.constant 0 : i32
    return %arg0, %c0_i32 : i32, i32
  }
}

</mosaic_0001>

<bundles_post_ra>
// kernel: gate_conv_forward.1
= control target key start
LH: loop header
LB: loop body
LE: loop exit
PB: predicated region body
PF: predicated region fallthrough
CT: control target
= control target key end

     0   :  { %s1091_s12 = smov 0   ;;  %s1444_s0 = inlined_call_operand.vmem [shape: f32[34,1,9,8], index: 0, kind: input, shape index: {}]   ;;  %s1445_s1 = inlined_call_operand.vmem [shape: f32[32,256], index: 1, kind: input, shape index: {}]   ;;  %s1446_s2 = inlined_call_operand.vmem [shape: f32[1,256], index: 2, kind: input, shape index: {}]   ;;  %s1447_s3 = inlined_call_operand.vmem [shape: f32[256,128], index: 3, kind: output, shape index: {}]  }
   0x1 LB: > { %s899_s13 = sadd.s32 4294967295, %s1065_s12   ;;  %p903_p0 = scmp.ge.s32.totalorder %s1065_s12, 1  ;;  %s1065_s12 = sphi %s1091_s12, %s13_s12  }
   0x2   : > { %p139_p1 = scmp.lt.s32.totalorder %s1065_s12, 3 }
   0x4   : > { %p140_p2 = pnand %p903_p0, %p139_p1 }
   0x5   : > { %s164_s14 = smul.u32 (!%p140_p2), 17, %s899_s13  ;;  %s1067_s8 = smov (!%p140_p2), 16  }
   0x6   : > { %143 = sbr.rel (%p140_p2) target bundleno = 461 (0x1cd), region = 32  ;;  %s1068_s9 = smov (!%p140_p2), 8  }
   0x7   : > { %p165_p3 = scmp.lt.s32.totalorder (!%p140_p2), %s164_s14, 33  ;;  %s1070_s10 = smov (!%p140_p2), 24  }
   0x8   : > { %s906_s15 = sshll.u32 (!%p140_p2), %s899_s13, 4 }
   0x9   : > { %p172_p4 = scmp.lt.s32.totalorder (!%p140_p2), %s906_s15, 31 }
   0xb   : > { %v492_v0 = vld [vmem:[%s1445_s1 + $0x38] sm:$0xff]  ;;  %v491_v1 = vld [vmem:[%s1445_s1 + $0x30] sm:$0xff]  ;;  %v490_v2 = vld [vmem:[%s1445_s1 + $0x28] sm:$0xff]  ;;  %s1449_s14 = smov (!%p165_p3, %s164_s14), 33  ;;  %v1069_v12 = vmov 0.0   ;;  %vm434_vm0 = vcmask 64512  }
   0xc   : > { %578 = vmatprep.subr.mxu0 %v492_v0  ;;  %975 = vmatprep.subr.mxu1 %v492_v0  ;;  %v489_v3 = vld [vmem:[%s1445_s1 + $0x20] sm:$0xff]  ;;  %v488_v4 = vld [vmem:[%s1445_s1 + $0x18] sm:$0xff]  ;;  %v487_v5 = vld [vmem:[%s1445_s1 + $0x10] sm:$0xff]  ;;  %s974_s4 = sshll.u32 %s1449_s14, 4  ;;  %vm451_vm1 = vcmask 130048   ;;  %vm468_vm2 = vcmask 195584  }
   0xd   : > { %579 = vmatpush1.msra.mxu0 %v491_v1  ;;  %979 = vmatpush1.msra.mxu1 %v491_v1  ;;  %v486_v6 = vld [vmem:[%s1445_s1 + $0x8] sm:$0xff]  ;;  %v485_v7 = vld [vmem:[%s1445_s1] sm:$0xff]  ;;  %s1128_s7 = scalar_lea.vmem %s1444_s0, %s974_s4  ;;  %vm505_vm3 = vcmask 261120   ;;  %s1451_s15 = smov (!%p172_p4, %s906_s15), 31 }
   0xe   : > { %580 = vmatprep.subr.mxu0 %v490_v2  ;;  %976 = vmatprep.subr.mxu1 %v490_v2  ;;  %v1131_v8 = vld [vmem:[%s1128_s7 + $0x10] sm:$0xff]  ;;  %v193_v9 = vld [vmem:[%s1128_s7 + $0x1] sm:$0xff]  ;;  %s907_s13 = sshll.u32 %s1451_s15, 3 }
   0xf   : > { %581 = vmatpush1.msra.mxu0 %v489_v3  ;;  %980 = vmatpush1.msra.mxu1 %v489_v3  ;;  %v1138_v10 = vld [vmem:[%s1128_s7 + $0x90] sm:$0xff]  ;;  %v1141_v11 = vld [vmem:[%s1128_s7 + $0x81] sm:$0xff]  ;;  %s1378_s18 = scalar_lea.vmem %s1447_s3, %s907_s13 }
  0x10   : > { %582 = vmatprep.subr.mxu0 %v488_v4  ;;  %977 = vmatprep.subr.mxu1 %v488_v4  ;;  %v932_v13 = vld [vmem:[%s1128_s7 + $0x91] sm:$0xff]  ;;  %v1156_v15 = vld [vmem:[%s1128_s7 + $0xa0] sm:$0xff] }
  0x11   : > { %583 = vmatpush1.msra.mxu0 %v487_v5  ;;  %981 = vmatpush1.msra.mxu1 %v487_v5  ;;  %v924_v14 = vld [vmem:[%s1128_s7 + $0x11] sm:$0xff]  ;;  %v1159_v16 = vld [vmem:[%s1128_s7 + $0x20] sm:$0xff] }
  0x12   : > { %584 = vmatprep.subr.mxu0 %v486_v6  ;;  %978 = vmatprep.subr.mxu1 %v486_v6  ;;  %v933_v17 = vld [vmem:[%s1128_s7 + $0xa1] sm:$0xff]  ;;  %v1172_v19 = vld [vmem:[%s1128_s7 + $0xb0] sm:$0xff] }
  0x13   : > { %585 = vmatpush1.msra.mxu0 %v485_v7  ;;  %982 = vmatpush1.msra.mxu1 %v485_v7  ;;  %v925_v18 = vld [vmem:[%s1128_s7 + $0x21] sm:$0xff]  ;;  %v1175_v20 = vld [vmem:[%s1128_s7 + $0x30] sm:$0xff] }
  0x14   : > { %322 = vrot.lane.b32.xlu1 %v1131_v8, %s1067_s8  ;;  %258 = vrot.lane.b32.xlu0 %v193_v9, %s1068_s9  ;;  %v934_v21 = vld [vmem:[%s1128_s7 + $0xb1] sm:$0xff]  ;;  %v1188_v23 = vld [vmem:[%s1128_s7 + $0xc0] sm:$0xff] }
  0x15   : > { %618 = vmatprep.mubr.f32.mxu0 %v1069_v12  ;;  %666 = vmatprep.mubr.f32.mxu1 %v1069_v12  ;;  %v926_v22 = vld [vmem:[%s1128_s7 + $0x31] sm:$0xff]  ;;  %v1191_v24 = vld [vmem:[%s1128_s7 + $0x40] sm:$0xff] }
  0x16   : > { %v935_v25 = vld [vmem:[%s1128_s7 + $0xc1] sm:$0xff]  ;;  %v1204_v27 = vld [vmem:[%s1128_s7 + $0xd0] sm:$0xff] }
  0x17   : > { %v927_v26 = vld [vmem:[%s1128_s7 + $0x41] sm:$0xff]  ;;  %v1207_v28 = vld [vmem:[%s1128_s7 + $0x50] sm:$0xff] }
  0x18   : > { %338 = vrot.lane.b32.xlu1 %v1138_v10, %s1067_s8  ;;  %274 = vrot.lane.b32.xlu0 %v1141_v11, %s1068_s9  ;;  %v936_v29 = vld [vmem:[%s1128_s7 + $0xd1] sm:$0xff]  ;;  %v1220_v31 = vld [vmem:[%s1128_s7 + $0xe0] sm:$0xff] }
  0x19   : > { %v928_v30 = vld [vmem:[%s1128_s7 + $0x51] sm:$0xff]  ;;  %v1223_v32 = vld [vmem:[%s1128_s7 + $0x60] sm:$0xff] }
  0x1a   : > { %v937_v33 = vld [vmem:[%s1128_s7 + $0xe1] sm:$0xff]  ;;  %v1236_v35 = vld [vmem:[%s1128_s7 + $0xf0] sm:$0xff] }
  0x1b   : > { %v929_v34 = vld [vmem:[%s1128_s7 + $0x61] sm:$0xff]  ;;  %v1239_v36 = vld [vmem:[%s1128_s7 + $0x70] sm:$0xff] }
  0x1c   : > { %402 = vrot.lane.b32.xlu1 %v932_v13, %s1070_s10  ;;  %386 = vrot.lane.b32.xlu0 %v924_v14, %s1070_s10  ;;  %v938_v37 = vld [vmem:[%s1128_s7 + $0xf1] sm:$0xff]  ;;  %v923_v39 = vld [vmem:[%s1128_s7 + $0x100] sm:$0xff] }
  0x1d   : > { %v930_v38 = vld [vmem:[%s1128_s7 + $0x71] sm:$0xff]  ;;  %v915_v40 = vld [vmem:[%s1128_s7 + $0x80] sm:$0xff] }
  0x1e   : > { %v939_v41 = vld [vmem:[%s1128_s7 + $0x101] sm:$0xff] }
  0x1f   : > { %v177_v44 = vld [vmem:[%s1128_s7] sm:$0xff] }
  0x20   : > { %276 = vrot.lane.b32.xlu1 %v932_v13, %s1068_s9  ;;  %260 = vrot.lane.b32.xlu0 %v924_v14, %s1068_s9 }
  0x24   : > { %340 = vrot.lane.b32.xlu1 %v1156_v15, %s1067_s8  ;;  %324 = vrot.lane.b32.xlu0 %v1159_v16, %s1067_s8 }
  0x28   : > { %404 = vrot.lane.b32.xlu1 %v933_v17, %s1070_s10  ;;  %388 = vrot.lane.b32.xlu0 %v925_v18, %s1070_s10 }
  0x2c   : > { %278 = vrot.lane.b32.xlu1 %v933_v17, %s1068_s9  ;;  %262 = vrot.lane.b32.xlu0 %v925_v18, %s1068_s9 }
  0x30   : > { %342 = vrot.lane.b32.xlu1 %v1172_v19, %s1067_s8  ;;  %326 = vrot.lane.b32.xlu0 %v1175_v20, %s1067_s8 }
  0x34   : > { %406 = vrot.lane.b32.xlu1 %v934_v21, %s1070_s10  ;;  %390 = vrot.lane.b32.xlu0 %v926_v22, %s1070_s10 }
  0x38   : > { %280 = vrot.lane.b32.xlu1 %v934_v21, %s1068_s9  ;;  %264 = vrot.lane.b32.xlu0 %v926_v22, %s1068_s9 }
  0x3c   : > { %344 = vrot.lane.b32.xlu1 %v1188_v23, %s1067_s8  ;;  %328 = vrot.lane.b32.xlu0 %v1191_v24, %s1067_s8 }
  0x40   : > { %408 = vrot.lane.b32.xlu1 %v935_v25, %s1070_s10  ;;  %392 = vrot.lane.b32.xlu0 %v927_v26, %s1070_s10 }
  0x44   : > { %282 = vrot.lane.b32.xlu1 %v935_v25, %s1068_s9  ;;  %266 = vrot.lane.b32.xlu0 %v927_v26, %s1068_s9 }
  0x48   : > { %346 = vrot.lane.b32.xlu1 %v1204_v27, %s1067_s8  ;;  %330 = vrot.lane.b32.xlu0 %v1207_v28, %s1067_s8 }
  0x4c   : > { %410 = vrot.lane.b32.xlu1 %v936_v29, %s1070_s10  ;;  %394 = vrot.lane.b32.xlu0 %v928_v30, %s1070_s10 }
  0x50   : > { %284 = vrot.lane.b32.xlu1 %v936_v29, %s1068_s9  ;;  %268 = vrot.lane.b32.xlu0 %v928_v30, %s1068_s9 }
  0x54   : > { %348 = vrot.lane.b32.xlu1 %v1220_v31, %s1067_s8  ;;  %332 = vrot.lane.b32.xlu0 %v1223_v32, %s1067_s8 }
  0x58   : > { %412 = vrot.lane.b32.xlu1 %v937_v33, %s1070_s10  ;;  %396 = vrot.lane.b32.xlu0 %v929_v34, %s1070_s10 }
  0x5c   : > { %286 = vrot.lane.b32.xlu1 %v937_v33, %s1068_s9  ;;  %270 = vrot.lane.b32.xlu0 %v929_v34, %s1068_s9 }
  0x60   : > { %350 = vrot.lane.b32.xlu1 %v1236_v35, %s1067_s8  ;;  %334 = vrot.lane.b32.xlu0 %v1239_v36, %s1067_s8 }
  0x64   : > { %414 = vrot.lane.b32.xlu1 %v938_v37, %s1070_s10  ;;  %398 = vrot.lane.b32.xlu0 %v930_v38, %s1070_s10 }
  0x68   : > { %288 = vrot.lane.b32.xlu1 %v938_v37, %s1068_s9  ;;  %272 = vrot.lane.b32.xlu0 %v930_v38, %s1068_s9 }
  0x6c   : > { %352 = vrot.lane.b32.xlu1 %v923_v39, %s1067_s8  ;;  %336 = vrot.lane.b32.xlu0 %v915_v40, %s1067_s8 }
  0x70   : > { %416 = vrot.lane.b32.xlu1 %v939_v41, %s1070_s10  ;;  %400 = vrot.lane.b32.xlu0 %v1141_v11, %s1070_s10 }
  0x86   : > { %v323_v42 = vpop.permute.xlu1 %322  ;;  %v259_v43 = vpop.permute.xlu0 %258 }
  0x87   : > { %v435_v47 = vsel %vm434_vm0, %v177_v44, %v259_v43 }
  0x88   : > { %v452_v52 = vsel %vm451_vm1, %v435_v47, %v323_v42 }
  0x8a   : > { %v339_v45 = vpop.permute.xlu1 %338  ;;  %v275_v46 = vpop.permute.xlu0 %274 }
  0x8b   : > { %v443_v48 = vsel %vm434_vm0, %v915_v40, %v275_v46 }
  0x8c   : > { %v460_v50 = vsel %vm451_vm1, %v443_v48, %v339_v45 }
  0x8e   : > { %v403_v49 = vpop.permute.xlu1 %402  ;;  %v387_v51 = vpop.permute.xlu0 %386 }
  0x8f   : > { %v477_v53 = vsel %vm468_vm2, %v460_v50, %v403_v49  ;;  %v469_v54 = vsel %vm468_vm2, %v452_v52, %v387_v51 }
  0x90   : > { %940 = vmatmul.mubr.msk.f32.vlgmr.msra.gmra.mxu0 %vm505_vm3, %v469_v54  ;;  %948 = vmatmul.mubr.msk.f32.vlgmr.msra.gmra.mxu1 %vm505_vm3, %v477_v53 }
  0x91   : > { %624 = vmatprep.mubr.f32.mxu0 %v1069_v12  ;;  %672 = vmatprep.mubr.f32.mxu1 %v1069_v12 }
  0x92   : > { %v277_v55 = vpop.permute.xlu1 %276  ;;  %v261_v56 = vpop.permute.xlu0 %260 }
  0x93   : > { %v444_v59 = vsel %vm434_vm0, %v1138_v10, %v277_v55  ;;  %v436_v60 = vsel %vm434_vm0, %v1131_v8, %v261_v56 }
  0x96   : > { %v341_v57 = vpop.permute.xlu1 %340  ;;  %v325_v58 = vpop.permute.xlu0 %324 }
  0x97   : > { %v461_v61 = vsel %vm451_vm1, %v444_v59, %v341_v57  ;;  %v453_v62 = vsel %vm451_vm1, %v436_v60, %v325_v58 }
  0x9a   : > { %v405_v63 = vpop.permute.xlu1 %404  ;;  %v389_v0 = vpop.permute.xlu0 %388 }
  0x9b   : > { %v478_v1 = vsel %vm468_vm2, %v461_v61, %v405_v63  ;;  %v470_v2 = vsel %vm468_vm2, %v453_v62, %v389_v0 }
  0x9c   : > { %941 = vmatmul.mubr.msk.f32.gmra.mxu0 %vm505_vm3, %v470_v2  ;;  %949 = vmatmul.mubr.msk.f32.gmra.mxu1 %vm505_vm3, %v478_v1 }
  0x9d   : > { %630 = vmatprep.mubr.f32.mxu0 %v1069_v12  ;;  %678 = vmatprep.mubr.f32.mxu1 %v1069_v12 }
  0x9e   : > { %v279_v3 = vpop.permute.xlu1 %278  ;;  %v263_v4 = vpop.permute.xlu0 %262 }
  0x9f   : > { %v445_v7 = vsel %vm434_vm0, %v1156_v15, %v279_v3  ;;  %v437_v8 = vsel %vm434_vm0, %v1159_v16, %v263_v4 }
  0xa2   : > { %v343_v5 = vpop.permute.xlu1 %342  ;;  %v327_v6 = vpop.permute.xlu0 %326 }
  0xa3   : > { %v462_v9 = vsel %vm451_vm1, %v445_v7, %v343_v5  ;;  %v454_v10 = vsel %vm451_vm1, %v437_v8, %v327_v6 }
  0xa6   : > { %v407_v11 = vpop.permute.xlu1 %406  ;;  %v391_v13 = vpop.permute.xlu0 %390 }
  0xa7   : > { %v479_v14 = vsel %vm468_vm2, %v462_v9, %v407_v11  ;;  %v471_v17 = vsel %vm468_vm2, %v454_v10, %v391_v13 }
  0xa8   : > { %942 = vmatmul.mubr.msk.f32.gmra.mxu0 %vm505_vm3, %v471_v17  ;;  %950 = vmatmul.mubr.msk.f32.gmra.mxu1 %vm505_vm3, %v479_v14  ;;  %v495_v14 = vlaneseq }
  0xa9   : > { %636 = vmatprep.mubr.f32.mxu0 %v1069_v12  ;;  %684 = vmatprep.mubr.f32.mxu1 %v1069_v12 }
  0xaa   : > { %v281_v15 = vpop.permute.xlu1 %280  ;;  %v265_v16 = vpop.permute.xlu0 %264  ;;  %v496_v17 = vshrl.u32 %v495_v14, 7 }
  0xab   : > { %v446_v22 = vsel %vm434_vm0, %v1172_v19, %v281_v15  ;;  %v438_v25 = vsel %vm434_vm0, %v1175_v20, %v265_v16 }
  0xae   : > { %v345_v18 = vpop.permute.xlu1 %344  ;;  %v329_v21 = vpop.permute.xlu0 %328 }
  0xaf   : > { %v463_v26 = vsel %vm451_vm1, %v446_v22, %v345_v18  ;;  %v455_v29 = vsel %vm451_vm1, %v438_v25, %v329_v21 }
  0xb2   : > { %v409_v30 = vpop.permute.xlu1 %408  ;;  %v393_v33 = vpop.permute.xlu0 %392 }
  0xb3   : > { %v480_v34 = vsel %vm468_vm2, %v463_v26, %v409_v30  ;;  %v472_v37 = vsel %vm468_vm2, %v455_v29, %v393_v33 }
  0xb4   : > { %943 = vmatmul.mubr.msk.f32.gmra.mxu0 %vm505_vm3, %v472_v37  ;;  %951 = vmatmul.mubr.msk.f32.gmra.mxu1 %vm505_vm3, %v480_v34 }
  0xb5   : > { %642 = vmatprep.mubr.f32.mxu0 %v1069_v12  ;;  %690 = vmatprep.mubr.f32.mxu1 %v1069_v12 }
  0xb6   : > { %v283_v19 = vpop.permute.xlu1 %282  ;;  %v267_v20 = vpop.permute.xlu0 %266 }
  0xb7   : > { %v447_v40 = vsel %vm434_vm0, %v1188_v23, %v283_v19  ;;  %v439_v41 = vsel %vm434_vm0, %v1191_v24, %v267_v20 }
  0xba   : > { %v347_v38 = vpop.permute.xlu1 %346  ;;  %v331_v39 = vpop.permute.xlu0 %330 }
  0xbb   : > { %v464_v42 = vsel %vm451_vm1, %v447_v40, %v347_v38  ;;  %v456_v43 = vsel %vm451_vm1, %v439_v41, %v331_v39 }
  0xbe   : > { %v411_v44 = vpop.permute.xlu1 %410  ;;  %v395_v45 = vpop.permute.xlu0 %394 }
  0xbf   : > { %v481_v46 = vsel %vm468_vm2, %v464_v42, %v411_v44  ;;  %v473_v47 = vsel %vm468_vm2, %v456_v43, %v395_v45 }
  0xc0   : > { %944 = vmatmul.mubr.msk.f32.gmra.mxu0 %vm505_vm3, %v473_v47  ;;  %952 = vmatmul.mubr.msk.f32.gmra.mxu1 %vm505_vm3, %v481_v46 }
  0xc1   : > { %648 = vmatprep.mubr.f32.mxu0 %v1069_v12  ;;  %696 = vmatprep.mubr.f32.mxu1 %v1069_v12 }
  0xc2   : > { %v285_v23 = vpop.permute.xlu1 %284  ;;  %v269_v24 = vpop.permute.xlu0 %268 }
  0xc3   : > { %v448_v50 = vsel %vm434_vm0, %v1204_v27, %v285_v23  ;;  %v440_v51 = vsel %vm434_vm0, %v1207_v28, %v269_v24  ;;  %v497_v24 = vsub.s32 0, %v496_v17 }
  0xc6   : > { %v349_v48 = vpop.permute.xlu1 %348  ;;  %v333_v49 = vpop.permute.xlu0 %332 }
  0xc7   : > { %v465_v52 = vsel %vm451_vm1, %v448_v50, %v349_v48  ;;  %v457_v53 = vsel %vm451_vm1, %v440_v51, %v333_v49 }
  0xca   : > { %v413_v54 = vpop.permute.xlu1 %412  ;;  %v397_v55 = vpop.permute.xlu0 %396 }
  0xcb   : > { %v482_v56 = vsel %vm468_vm2, %v465_v52, %v413_v54  ;;  %v474_v57 = vsel %vm468_vm2, %v457_v53, %v397_v55 }
  0xcc   : > { %945 = vmatmul.mubr.msk.f32.gmra.mxu0 %vm505_vm3, %v474_v57  ;;  %953 = vmatmul.mubr.msk.f32.gmra.mxu1 %vm505_vm3, %v482_v56 }
  0xcd   : > { %654 = vmatprep.mubr.f32.mxu0 %v1069_v12  ;;  %702 = vmatprep.mubr.f32.mxu1 %v1069_v12 }
  0xce   : > { %v287_v27 = vpop.permute.xlu1 %286  ;;  %v271_v28 = vpop.permute.xlu0 %270 }
  0xcf   : > { %v449_v60 = vsel %vm434_vm0, %v1220_v31, %v287_v27  ;;  %v441_v61 = vsel %vm434_vm0, %v1223_v32, %v271_v28 }
  0xd2   : > { %v351_v58 = vpop.permute.xlu1 %350  ;;  %v335_v59 = vpop.permute.xlu0 %334 }
  0xd3   : > { %v466_v62 = vsel %vm451_vm1, %v449_v60, %v351_v58  ;;  %v458_v63 = vsel %vm451_vm1, %v441_v61, %v335_v59 }
  0xd6   : > { %v415_v0 = vpop.permute.xlu1 %414  ;;  %v399_v1 = vpop.permute.xlu0 %398 }
  0xd7   : > { %v483_v2 = vsel %vm468_vm2, %v466_v62, %v415_v0  ;;  %v475_v3 = vsel %vm468_vm2, %v458_v63, %v399_v1 }
  0xd8   : > { %946 = vmatmul.mubr.msk.f32.gmra.mxu0 %vm505_vm3, %v475_v3  ;;  %954 = vmatmul.mubr.msk.f32.gmra.mxu1 %vm505_vm3, %v483_v2 }
  0xd9   : > { %660 = vmatprep.mubr.f32.mxu0 %v1069_v12  ;;  %708 = vmatprep.mubr.f32.mxu1 %v1069_v12 }
  0xda   : > { %v289_v31 = vpop.permute.xlu1 %288  ;;  %v273_v32 = vpop.permute.xlu0 %272 }
  0xdb   : > { %v450_v6 = vsel %vm434_vm0, %v1236_v35, %v289_v31  ;;  %v442_v7 = vsel %vm434_vm0, %v1239_v36, %v273_v32  ;;  %v501_v35 = vsub.s32 1, %v496_v17  ;;  %v493_v36 = vld [vmem:[%s1446_s2] sm:$0x3] }
  0xdc   : > { %v1371_v52 = vrot.slane %v493_v36, %v497_v24 }
  0xdd   : > { %v1355_v15 = vrot.slane %v493_v36, %v501_v35 }
  0xde   : > { %v353_v4 = vpop.permute.xlu1 %352  ;;  %v337_v5 = vpop.permute.xlu0 %336 }
  0xdf   : > { %v467_v8 = vsel %vm451_vm1, %v450_v6, %v353_v4  ;;  %v459_v9 = vsel %vm451_vm1, %v442_v7, %v337_v5 }
  0xe2   : > { %v417_v10 = vpop.permute.xlu1 %416  ;;  %v401_v11 = vpop.permute.xlu0 %400 }
  0xe3   : > { %v484_v13 = vsel %vm468_vm2, %v467_v8, %v417_v10  ;;  %v476_v12 = vsel %vm468_vm2, %v459_v9, %v401_v11 }
  0xe4   : > { %947 = vmatmul.mubr.msk.f32.gmra.mxu0 %vm505_vm3, %v476_v12  ;;  %955 = vmatmul.mubr.msk.f32.gmra.mxu1 %vm505_vm3, %v484_v13 }
 0x150   : > { %v620_v16 = vpop.f32.mrf.mxu0  ;;  %v668_v18 = vpop.f32.mrf.mxu1 }
 0x151   : > { %v621_v57 = vadd.f32 %v620_v16, %v1371_v52  ;;  %v669_v28 = vadd.f32 %v668_v18, %v1371_v52 }
 0x152   : > { %v622_v21 = vpop.f32.mrf.mxu0  ;;  %v670_v22 = vpop.f32.mrf.mxu1 }
 0x153   : > { %v623_v25 = vadd.f32 %v622_v21, %v1355_v15  ;;  %v671_v26 = vadd.f32 %v670_v22, %v1355_v15 }
 0x155   : > { %v956_v29 = vmul.f32 -1.442695, %v623_v25  ;;  %v964_v30 = vmul.f32 -1.442695, %v671_v26 }
 0x157   : > { %995 = vpow2.f32 %v956_v29 }
 0x158   : > { %997 = vpow2.f32 %v964_v30 }
 0x15c   : > { %v626_v33 = vpop.f32.mrf.mxu0  ;;  %v1359_v34 = vpop.f32.mrf.mxu1 }
 0x15d   : > { %v627_v7 = vadd.f32 %v626_v33, %v1371_v52  ;;  %v675_v9 = vadd.f32 %v1359_v34, %v1371_v52 }
 0x15e   : > { %v628_v37 = vpop.f32.mrf.mxu0  ;;  %v676_v19 = vpop.f32.mrf.mxu1 }
 0x15f   : > { %v629_v20 = vadd.f32 %v628_v37, %v1355_v15  ;;  %v677_v38 = vadd.f32 %v676_v19, %v1355_v15 }
 0x161   : > { %v957_v39 = vmul.f32 -1.442695, %v629_v20  ;;  %v965_v40 = vmul.f32 -1.442695, %v677_v38 }
 0x163   : > { %999 = vpow2.f32 %v957_v39 }
 0x164   : > { %v996_v41 = vpop.eup %995  ;;  %1001 = vpow2.f32 %v965_v40 }
 0x165   : > { %v998_v42 = vpop.eup %997  ;;  %v763_v43 = vadd.f32 1.0, %v996_v41 }
 0x166   : > { %v771_v44 = vadd.f32 1.0, %v998_v42 }
 0x167   : > { %1003 = vrcp.f32 %v763_v43 }
 0x168   : > { %1005 = vrcp.f32 %v771_v44  ;;  %v1365_v45 = vpop.f32.mrf.mxu0  ;;  %v1367_v46 = vpop.f32.mrf.mxu1 }
 0x169   : > { %v633_v30 = vadd.f32 %v1365_v45, %v1371_v52  ;;  %v681_v34 = vadd.f32 %v1367_v46, %v1371_v52 }
 0x16a   : > { %v634_v47 = vpop.f32.mrf.mxu0  ;;  %v682_v23 = vpop.f32.mrf.mxu1 }
 0x16b   : > { %v635_v48 = vadd.f32 %v634_v47, %v1355_v15  ;;  %v683_v49 = vadd.f32 %v682_v23, %v1355_v15 }
 0x16d   : > { %v958_v50 = vmul.f32 -1.442695, %v635_v48  ;;  %v966_v51 = vmul.f32 -1.442695, %v683_v49 }
 0x16f   : > { %1007 = vpow2.f32 %v958_v50 }
 0x170   : > { %v1000_v53 = vpop.eup %999  ;;  %1009 = vpow2.f32 %v966_v51 }
 0x171   : > { %v1002_v54 = vpop.eup %1001  ;;  %v764_v55 = vadd.f32 1.0, %v1000_v53 }
 0x172   : > { %v772_v56 = vadd.f32 1.0, %v1002_v54 }
 0x173   : > { %1011 = vrcp.f32 %v764_v55 }
 0x174   : > { %v1004_v27 = vpop.eup %1003  ;;  %1013 = vrcp.f32 %v772_v56  ;;  %v1380_v58 = vpop.f32.mrf.mxu0 }
 0x175   : > { %v1382_v59 = vpop.f32.mrf.mxu1  ;;  %v1006_v60 = vpop.eup %1005  ;;  %v811_v61 = vmul.f32 %v1004_v27, %v621_v57  ;;  %v639_v48 = vadd.f32 %v1380_v58, %v1371_v52 }
 0x176   : > { %v819_v62 = vmul.f32 %v1006_v60, %v669_v28  ;;  %v640_v63 = vpop.f32.mrf.mxu0  ;;  %v687_v50 = vadd.f32 %v1382_v59, %v1371_v52 }
 0x177   : > { %v688_v0 = vpop.f32.mrf.mxu1  ;;  %827 = vst [vmem:[%s1378_s18] sm:$0xff] %v811_v61  ;;  %v641_v1 = vadd.f32 %v640_v63, %v1355_v15 }
 0x178   : > { %v689_v2 = vadd.f32 %v688_v0, %v1355_v15  ;;  %835 = vst [vmem:[%s1378_s18 + $0x40] sm:$0xff] %v819_v62 }
 0x179   : > { %v959_v3 = vmul.f32 -1.442695, %v641_v1 }
 0x17a   : > { %v967_v31 = vmul.f32 -1.442695, %v689_v2 }
 0x17b   : > { %1015 = vpow2.f32 %v959_v3 }
 0x17c   : > { %v1008_v32 = vpop.eup %1007  ;;  %1017 = vpow2.f32 %v967_v31 }
 0x17d   : > { %v1010_v4 = vpop.eup %1009  ;;  %v765_v5 = vadd.f32 1.0, %v1008_v32 }
 0x17e   : > { %v773_v6 = vadd.f32 1.0, %v1010_v4 }
 0x17f   : > { %1019 = vrcp.f32 %v765_v5 }
 0x180   : > { %v1012_v8 = vpop.eup %1011  ;;  %1021 = vrcp.f32 %v773_v6  ;;  %v1391_v10 = vpop.f32.mrf.mxu0 }
 0x181   : > { %v1393_v11 = vpop.f32.mrf.mxu1  ;;  %v1014_v13 = vpop.eup %1013  ;;  %v812_v12 = vmul.f32 %v1012_v8, %v627_v7  ;;  %v645_v1 = vadd.f32 %v1391_v10, %v1371_v52 }
 0x182   : > { %v820_v14 = vmul.f32 %v1014_v13, %v675_v9  ;;  %v646_v17 = vpop.f32.mrf.mxu0  ;;  %v693_v3 = vadd.f32 %v1393_v11, %v1371_v52 }
 0x183   : > { %v694_v35 = vpop.f32.mrf.mxu1  ;;  %828 = vst [vmem:[%s1378_s18 + $0x8] sm:$0xff] %v812_v12  ;;  %v647_v36 = vadd.f32 %v646_v17, %v1355_v15 }
 0x184   : > { %v695_v16 = vadd.f32 %v694_v35, %v1355_v15  ;;  %836 = vst [vmem:[%s1378_s18 + $0x48] sm:$0xff] %v820_v14 }
 0x185   : > { %v960_v18 = vmul.f32 -1.442695, %v647_v36 }
 0x186   : > { %v968_v21 = vmul.f32 -1.442695, %v695_v16 }
 0x187   : > { %1023 = vpow2.f32 %v960_v18 }
 0x188   : > { %v1016_v22 = vpop.eup %1015  ;;  %1025 = vpow2.f32 %v968_v21 }
 0x189   : > { %v1018_v25 = vpop.eup %1017  ;;  %v766_v26 = vadd.f32 1.0, %v1016_v22 }
 0x18a   : > { %v774_v29 = vadd.f32 1.0, %v1018_v25 }
 0x18b   : > { %1027 = vrcp.f32 %v766_v26 }
 0x18c   : > { %v1020_v33 = vpop.eup %1019  ;;  %1029 = vrcp.f32 %v774_v29  ;;  %v1403_v37 = vpop.f32.mrf.mxu0 }
 0x18d   : > { %v1405_v19 = vpop.f32.mrf.mxu1  ;;  %v1022_v20 = vpop.eup %1021  ;;  %v813_v38 = vmul.f32 %v1020_v33, %v633_v30  ;;  %v651_v36 = vadd.f32 %v1403_v37, %v1371_v52 }
 0x18e   : > { %v821_v39 = vmul.f32 %v1022_v20, %v681_v34  ;;  %v652_v40 = vpop.f32.mrf.mxu0  ;;  %v699_v18 = vadd.f32 %v1405_v19, %v1371_v52 }
 0x18f   : > { %v700_v41 = vpop.f32.mrf.mxu1  ;;  %829 = vst [vmem:[%s1378_s18 + $0x10] sm:$0xff] %v813_v38  ;;  %v653_v42 = vadd.f32 %v652_v40, %v1355_v15 }
 0x190   : > { %v701_v43 = vadd.f32 %v700_v41, %v1355_v15  ;;  %837 = vst [vmem:[%s1378_s18 + $0x50] sm:$0xff] %v821_v39 }
 0x191   : > { %v961_v44 = vmul.f32 -1.442695, %v653_v42 }
 0x192   : > { %v969_v45 = vmul.f32 -1.442695, %v701_v43 }
 0x193   : > { %1031 = vpow2.f32 %v961_v44 }
 0x194   : > { %v1024_v46 = vpop.eup %1023  ;;  %1033 = vpow2.f32 %v969_v45 }
 0x195   : > { %v1026_v47 = vpop.eup %1025  ;;  %v767_v23 = vadd.f32 1.0, %v1024_v46 }
 0x196   : > { %v775_v24 = vadd.f32 1.0, %v1026_v47 }
 0x197   : > { %1035 = vrcp.f32 %v767_v23 }
 0x198   : > { %v1028_v49 = vpop.eup %1027  ;;  %1037 = vrcp.f32 %v775_v24  ;;  %v656_v51 = vpop.f32.mrf.mxu0 }
 0x199   : > { %v704_v53 = vpop.f32.mrf.mxu1  ;;  %v1030_v54 = vpop.eup %1029  ;;  %v814_v55 = vmul.f32 %v1028_v49, %v639_v48  ;;  %v657_v33 = vadd.f32 %v656_v51, %v1371_v52 }
 0x19a   : > { %v822_v56 = vmul.f32 %v1030_v54, %v687_v50  ;;  %v658_v57 = vpop.f32.mrf.mxu0  ;;  %v705_v37 = vadd.f32 %v704_v53, %v1371_v52 }
 0x19b   : > { %v706_v27 = vpop.f32.mrf.mxu1  ;;  %830 = vst [vmem:[%s1378_s18 + $0x18] sm:$0xff] %v814_v55  ;;  %v659_v28 = vadd.f32 %v658_v57, %v1355_v15 }
 0x19c   : > { %v707_v60 = vadd.f32 %v706_v27, %v1355_v15  ;;  %838 = vst [vmem:[%s1378_s18 + $0x58] sm:$0xff] %v822_v56 }
 0x19d   : > { %v962_v58 = vmul.f32 -1.442695, %v659_v28 }
 0x19e   : > { %v970_v61 = vmul.f32 -1.442695, %v707_v60 }
 0x19f   : > { %1039 = vpow2.f32 %v962_v58 }
 0x1a0   : > { %v1032_v62 = vpop.eup %1031  ;;  %1041 = vpow2.f32 %v970_v61 }
 0x1a1   : > { %v1034_v59 = vpop.eup %1033  ;;  %v768_v63 = vadd.f32 1.0, %v1032_v62 }
 0x1a2   : > { %v776_v0 = vadd.f32 1.0, %v1034_v59 }
 0x1a3   : > { %1043 = vrcp.f32 %v768_v63 }
 0x1a4   : > { %v1036_v2 = vpop.eup %1035  ;;  %1045 = vrcp.f32 %v776_v0  ;;  %v662_v31 = vpop.f32.mrf.mxu0 }
 0x1a5   : > { %v710_v32 = vpop.f32.mrf.mxu1  ;;  %v1038_v4 = vpop.eup %1037  ;;  %v815_v5 = vmul.f32 %v1036_v2, %v645_v1  ;;  %v663_v39 = vadd.f32 %v662_v31, %v1371_v52 }
 0x1a6   : > { %v823_v6 = vmul.f32 %v1038_v4, %v693_v3  ;;  %v664_v7 = vpop.f32.mrf.mxu0  ;;  %v711_v41 = vadd.f32 %v710_v32, %v1371_v52 }
 0x1a7   : > { %v712_v8 = vpop.f32.mrf.mxu1  ;;  %831 = vst [vmem:[%s1378_s18 + $0x20] sm:$0xff] %v815_v5  ;;  %v665_v9 = vadd.f32 %v664_v7, %v1355_v15 }
 0x1a8   : > { %v713_v13 = vadd.f32 %v712_v8, %v1355_v15  ;;  %839 = vst [vmem:[%s1378_s18 + $0x60] sm:$0xff] %v823_v6 }
 0x1a9   : > { %v963_v10 = vmul.f32 -1.442695, %v665_v9 }
 0x1aa   : > { %v971_v12 = vmul.f32 -1.442695, %v713_v13 }
 0x1ab   : > { %1047 = vpow2.f32 %v963_v10 }
 0x1ac   : > { %v1040_v11 = vpop.eup %1039  ;;  %1049 = vpow2.f32 %v971_v12 }
 0x1ad   : > { %v1042_v14 = vpop.eup %1041  ;;  %v769_v17 = vadd.f32 1.0, %v1040_v11 }
 0x1ae   : > { %v777_v35 = vadd.f32 1.0, %v1042_v14 }
 0x1af   : > { %1051 = vrcp.f32 %v769_v17 }
 0x1b0   : > { %v1044_v16 = vpop.eup %1043  ;;  %1053 = vrcp.f32 %v777_v35 }
 0x1b1   : > { %v1046_v15 = vpop.eup %1045  ;;  %v816_v21 = vmul.f32 %v1044_v16, %v651_v36 }
 0x1b2   : > { %v824_v22 = vmul.f32 %v1046_v15, %v699_v18 }
 0x1b3   : > { %832 = vst [vmem:[%s1378_s18 + $0x28] sm:$0xff] %v816_v21 }
 0x1b4   : > { %840 = vst [vmem:[%s1378_s18 + $0x68] sm:$0xff] %v824_v22 }
 0x1b8   : > { %v1048_v25 = vpop.eup %1047 }
 0x1b9   : > { %v1050_v26 = vpop.eup %1049  ;;  %v770_v29 = vadd.f32 1.0, %v1048_v25 }
 0x1ba   : > { %v778_v30 = vadd.f32 1.0, %v1050_v26 }
 0x1bb   : > { %1055 = vrcp.f32 %v770_v29 }
 0x1bc   : > { %v1052_v34 = vpop.eup %1051  ;;  %1057 = vrcp.f32 %v778_v30 }
 0x1bd   : > { %v1054_v19 = vpop.eup %1053  ;;  %v817_v20 = vmul.f32 %v1052_v34, %v657_v33 }
 0x1be   : > { %v825_v38 = vmul.f32 %v1054_v19, %v705_v37 }
 0x1bf   : > { %833 = vst [vmem:[%s1378_s18 + $0x30] sm:$0xff] %v817_v20 }
 0x1c0   : > { %841 = vst [vmem:[%s1378_s18 + $0x70] sm:$0xff] %v825_v38 }
 0x1c8   : > { %v1056_v40 = vpop.eup %1055 }
 0x1c9   : > { %v1058_v42 = vpop.eup %1057  ;;  %v818_v43 = vmul.f32 %v1056_v40, %v663_v39 }
 0x1ca   : > { %v826_v44 = vmul.f32 %v1058_v42, %v711_v41 }
 0x1cb   : > { %834 = vst [vmem:[%s1378_s18 + $0x38] sm:$0xff] %v818_v43 }
 0x1cc   : > { %842 = vst [vmem:[%s1378_s18 + $0x78] sm:$0xff] %v826_v44 }
 0x1cd PF: > { %s13_s12 = sadd.s32 1, %s1065_s12  }
 0x1ce   : > { %p10_p5 = scmp.ge.s32.totalorder %s13_s12, 4  }
 0x1d0   :  { %12 = sbr.rel (!%p10_p5) target bundleno = 1 (0x1), region = 63 }

</bundles_post_ra>
